<compile_context>
chip_gen: v5e
topology: v5e:2x2
jax: 0.10.0
libtpu: 0.0.40
codegen_flags: <defaults>
</compile_context>

<pallas_src>
import functools

import jax
import jax.numpy as jnp
from jax.experimental import pallas as pl
from jax.experimental.pallas import tpu as pltpu


def _softplus(x):
    # Matches torch.nn.Softplus(beta=1, threshold=20):
    #   x > 20 -> x  else -> log(1 + exp(x))   (single exp, f32, on the EUP)
    ex = jnp.exp(jnp.minimum(x, 20.0))
    return jnp.where(x > 20.0, x, jnp.log1p(ex))


def encoder_fc_kernel(z_dim, x_ref, w1_ref, b1_ref, wz_ref, bz_ref, out_ref):
    # x_ref : (TB, P)  f32   -> cast to bf16 here (no extra HBM pass over x)
    # w1_ref: (P, H)   bf16      b1_ref: (1, H)  f32
    # wz_ref: (H, ZP)  bf16 (= [W21^T | W22^T | zero-pad])
    # bz_ref: (1, ZP)  f32       out_ref: (TB, ZP) bf16
    x = x_ref[...].astype(jnp.bfloat16)

    # fc1 + softplus (MXU bf16 -> f32 accumulate, epilogue in f32)
    h = jnp.dot(x, w1_ref[...], preferred_element_type=jnp.float32)
    h = _softplus(h + b1_ref[...])                       # (TB, H) f32

    # Fused fc21|fc22 projection, lane-dense (TB, ZP) output slab.
    y = jnp.dot(h.astype(wz_ref.dtype), wz_ref[...],
                preferred_element_type=jnp.float32)
    y = y + bz_ref[...]                                  # (TB, ZP) f32

    # exp only on the z_scale lanes [z_dim, 2*z_dim); pad lanes stay 0.
    lane = jax.lax.broadcasted_iota(jnp.int32, y.shape, 1)
    is_scale = jnp.logical_and(lane >= z_dim, lane < 2 * z_dim)
    out_ref[...] = jnp.where(is_scale, jnp.exp(y), y).astype(out_ref.dtype)


def prepare_params(w1, b1, w21, b21, w22, b22, lane_pad=128):
    """One-time prep: transpose to (in, out), fuse fc21/fc22, pad lanes, cast.

    w*: PyTorch layout (out, in); b*: (out,).  Returns a dict of arrays only
    (static ints like z_dim stay outside the jit-traced pytree).
    """
    hidden_dim = w1.shape[0]
    z_dim = w21.shape[0]
    zp = max(lane_pad, -(-2 * z_dim // lane_pad) * lane_pad)  # lane-dense width

    w1_t = jnp.transpose(w1).astype(jnp.bfloat16)              # (P, H)
    wz = jnp.concatenate([jnp.transpose(w21), jnp.transpose(w22)], axis=1)
    wz = jnp.pad(wz, ((0, 0), (0, zp - 2 * z_dim))).astype(jnp.bfloat16)  # (H, ZP)

    b1_2d = b1.reshape(1, hidden_dim).astype(jnp.float32)
    bz = jnp.concatenate([b21, b22]).reshape(1, 2 * z_dim)
    bz = jnp.pad(bz, ((0, 0), (0, zp - 2 * z_dim))).astype(jnp.float32)   # (1, ZP)

    return dict(w1=w1_t, b1=b1_2d, wz=wz, bz=bz)


def _round_up(a, m):
    return (a + m - 1) // m * m


def _pick_batch_tile(n, tb_cap):
    """Batch tile: multiple of 8 sublanes, >=2 grid steps when possible
    (shards across v7x's two TensorCores), no full-array padding needed."""
    if n <= 8:
        return n                      # block dim == full array dim is allowed
    tb = min(tb_cap, _round_up(-(-n // 2), 8))
    return max(8, tb)


def encoder_fc(x_nchw, params, *, z_dim, tb_cap=2048):
    """x_nchw: (N, C, H, W) f32.  params: output of prepare_params().
    z_dim / tb_cap are static (jit static_argnames)."""
    w1, b1, wz, bz = params["w1"], params["b1"], params["wz"], params["bz"]
    p, hidden_dim = w1.shape
    zp = wz.shape[1]

    n = x_nchw.shape[0]
    # Reshape only (no copy, no cast, no pad): the bf16 cast happens in-kernel.
    x2 = x_nchw.reshape(n, p)

    tb = _pick_batch_tile(n, tb_cap)
    grid = (pl.cdiv(n, tb),)          # Pallas masks the partial last tile

    # VMEM budget: double-buffered x/out tiles + (double-buffered) resident
    # weights/biases + f32 intermediates; headroom, capped under v7x's 64 MiB.
    est = (2 * (tb * p * 4 + tb * zp * 2)
           + 2 * (p * hidden_dim * 2 + hidden_dim * zp * 2 + (hidden_dim + zp) * 4)
           + tb * p * 2 + tb * hidden_dim * 4 + tb * zp * 4)
    vmem_limit = int(min(60 * 1024 * 1024, max(32 * 1024 * 1024, 2 * est)))

    cost = pl.CostEstimate(
        flops=int(2 * n * (p * hidden_dim + hidden_dim * zp)),
        transcendentals=int(n * (2 * hidden_dim + zp)),   # softplus = exp+log1p, plus exp
        bytes_accessed=int(n * p * 4                       # f32 x read
                           + (p * hidden_dim + hidden_dim * zp) * 2
                           + (hidden_dim + zp) * 4
                           + n * zp * 2),                  # bf16 output write
    )

    out = pl.pallas_call(
        functools.partial(encoder_fc_kernel, z_dim),
        out_shape=jax.ShapeDtypeStruct((n, zp), jnp.bfloat16),
        grid=grid,
        in_specs=[
            pl.BlockSpec((tb, p), lambda i: (i, 0)),            # x: tiled batch
            pl.BlockSpec((p, hidden_dim), lambda i: (0, 0)),    # weights: VMEM-resident
            pl.BlockSpec((1, hidden_dim), lambda i: (0, 0)),
            pl.BlockSpec((hidden_dim, zp), lambda i: (0, 0)),
            pl.BlockSpec((1, zp), lambda i: (0, 0)),
        ],
        out_specs=pl.BlockSpec((tb, zp), lambda i: (i, 0)),
        compiler_params=pltpu.CompilerParams(
            dimension_semantics=("parallel",),
            vmem_limit_bytes=vmem_limit,
        ),
        cost_estimate=cost,
    )(x2, w1, b1, wz, bz)

    # TODO(synk): if large P/H variants are ever needed, add a K grid axis
    # ("arbitrary") with an f32 accumulator instead of keeping W1 VMEM-resident.
    z_loc = out[:, :z_dim].astype(jnp.float32)
    z_scale = out[:, z_dim:2 * z_dim].astype(jnp.float32)
    return z_loc, z_scale


if __name__ == "__main__":
    # Small shapes consistent with the module's forward:
    #   img_shape (C, H, W) = (4, 16, 16) -> pixels = 1024
    batch, c, hgt, wdt = 2, 4, 16, 16
    pixels = c * hgt * wdt
    hidden_dim = 128
    z_dim = 8

    key = jax.random.PRNGKey(0)
    kx, k1w, k1b, k21w, k21b, k22w, k22b = jax.random.split(key, 7)

    x = jax.random.normal(kx, (batch, c, hgt, wdt), dtype=jnp.float32)

    def init_linear(kw, kb, out_f, in_f):
        bound = 1.0 / jnp.sqrt(jnp.float32(in_f))
        w = jax.random.uniform(kw, (out_f, in_f), jnp.float32, -bound, bound)
        b = jax.random.uniform(kb, (out_f,), jnp.float32, -bound, bound)
        return w, b

    w1, b1 = init_linear(k1w, k1b, hidden_dim, pixels)
    w21, b21 = init_linear(k21w, k21b, z_dim, hidden_dim)
    w22, b22 = init_linear(k22w, k22b, z_dim, hidden_dim)

    # One-time weight prep (transpose / fuse / pad / bf16 cast), hoisted out
    # of the per-call hot path.
    params = prepare_params(w1, b1, w21, b21, w22, b22)

    fwd = jax.jit(encoder_fc, static_argnames=("z_dim", "tb_cap"))
    z_loc, z_scale = fwd(x, params, z_dim=z_dim)
    jax.block_until_ready((z_loc, z_scale))

    # Pure-JAX f32 reference check (bf16 matmul operands / bf16 output slab
    # -> looser tolerance).
    xf = x.reshape(batch, -1)
    h_ref = jax.nn.softplus(xf @ w1.T + b1)
    zloc_ref = h_ref @ w21.T + b21
    zscale_ref = jnp.exp(h_ref @ w22.T + b22)
    assert z_loc.shape == (batch, z_dim) and z_scale.shape == (batch, z_dim)
    assert jnp.allclose(z_loc, zloc_ref, atol=3e-2, rtol=3e-2)
    assert jnp.allclose(z_scale, zscale_ref, atol=3e-2, rtol=3e-2)

    print("KERNEL_OK")
</pallas_src>

<mosaic_0001>
module attributes {stable_mosaic.version = 11 : i64} {
  func.func @encoder_fc_kernel(%arg0: i32, %arg1: memref<2x1024xf32, #tpu.memory_space<vmem>>, %arg2: memref<1024x128xbf16, #tpu.memory_space<vmem>>, %arg3: memref<1x128xf32, #tpu.memory_space<vmem>>, %arg4: memref<128x128xbf16, #tpu.memory_space<vmem>>, %arg5: memref<1x128xf32, #tpu.memory_space<vmem>>, %arg6: memref<2x128xbf16, #tpu.memory_space<vmem>>) attributes {dimension_semantics = [#tpu.dimension_semantics<parallel>], iteration_bounds = array<i64: 1>, scalar_prefetch = 0 : i64, scratch_operands = 0 : i64, tpu.core_type = #tpu.core_type<tc>, window_params = [{transform_indices = @transform_0, window_bounds = array<i64: 2, 1024>}, {pipeline_mode = #tpu.pipeline_mode<synchronous>, transform_indices = @transform_1, window_bounds = array<i64: 1024, 128>}, {pipeline_mode = #tpu.pipeline_mode<synchronous>, transform_indices = @transform_2, window_bounds = array<i64: 1, 128>}, {pipeline_mode = #tpu.pipeline_mode<synchronous>, transform_indices = @transform_3, window_bounds = array<i64: 128, 128>}, {pipeline_mode = #tpu.pipeline_mode<synchronous>, transform_indices = @transform_4, window_bounds = array<i64: 1, 128>}, {transform_indices = @transform_5, window_bounds = array<i64: 2, 128>}]} {
    %c0 = arith.constant 0 : index
    %c0_0 = arith.constant 0 : index
    %0 = vector.load %arg1[%c0, %c0_0] : memref<2x1024xf32, #tpu.memory_space<vmem>>, vector<2x1024xf32>
    %1 = arith.truncf %0 : vector<2x1024xf32> to vector<2x1024xbf16>
    %c0_1 = arith.constant 0 : index
    %c0_2 = arith.constant 0 : index
    %2 = vector.load %arg2[%c0_1, %c0_2] : memref<1024x128xbf16, #tpu.memory_space<vmem>>, vector<1024x128xbf16>
    %cst = arith.constant dense<0.000000e+00> : vector<2x128xf32>
    %3 = tpu.matmul %1, %2, %cst {dimension_numbers = #tpu.dot_dimension_numbers<[1], [0], [0], [1], [0, 0, 1, 1], [], []>} : vector<2x1024xbf16>, vector<1024x128xbf16>, vector<2x128xf32> -> vector<2x128xf32>
    %c0_3 = arith.constant 0 : index
    %c0_4 = arith.constant 0 : index
    %4 = vector.load %arg3[%c0_3, %c0_4] : memref<1x128xf32, #tpu.memory_space<vmem>>, vector<1x128xf32>
    %5 = vector.broadcast %4 : vector<1x128xf32> to vector<2x128xf32>
    %6 = arith.addf %3, %5 : vector<2x128xf32>
    %cst_5 = arith.constant 2.000000e+01 : f32
    %7 = vector.broadcast %cst_5 : f32 to vector<2x128xf32>
    %8 = arith.minimumf %6, %7 : vector<2x128xf32>
    %9 = math.exp %8 : vector<2x128xf32>
    %cst_6 = arith.constant 2.000000e+01 : f32
    %10 = vector.broadcast %cst_6 : f32 to vector<2x128xf32>
    %11 = arith.cmpf ogt, %6, %10 : vector<2x128xf32>
    %12 = math.log1p %9 : vector<2x128xf32>
    %13 = arith.select %11, %6, %12 : vector<2x128xi1>, vector<2x128xf32>
    %14 = arith.truncf %13 : vector<2x128xf32> to vector<2x128xbf16>
    %c0_7 = arith.constant 0 : index
    %c0_8 = arith.constant 0 : index
    %15 = vector.load %arg4[%c0_7, %c0_8] : memref<128x128xbf16, #tpu.memory_space<vmem>>, vector<128x128xbf16>
    %cst_9 = arith.constant dense<0.000000e+00> : vector<2x128xf32>
    %16 = tpu.matmul %14, %15, %cst_9 {dimension_numbers = #tpu.dot_dimension_numbers<[1], [0], [0], [1], [0, 0, 1, 1], [], []>} : vector<2x128xbf16>, vector<128x128xbf16>, vector<2x128xf32> -> vector<2x128xf32>
    %c0_10 = arith.constant 0 : index
    %c0_11 = arith.constant 0 : index
    %17 = vector.load %arg5[%c0_10, %c0_11] : memref<1x128xf32, #tpu.memory_space<vmem>>, vector<1x128xf32>
    %18 = vector.broadcast %17 : vector<1x128xf32> to vector<2x128xf32>
    %19 = arith.addf %16, %18 : vector<2x128xf32>
    %20 = tpu.iota {dimensions = array<i32: 1>} : vector<2x128xi32>
    %c8_i32 = arith.constant 8 : i32
    %21 = vector.broadcast %c8_i32 : i32 to vector<2x128xi32>
    %22 = arith.cmpi sge, %20, %21 : vector<2x128xi32>
    %c16_i32 = arith.constant 16 : i32
    %23 = vector.broadcast %c16_i32 : i32 to vector<2x128xi32>
    %24 = arith.cmpi slt, %20, %23 : vector<2x128xi32>
    %25 = arith.andi %22, %24 : vector<2x128xi1>
    %26 = math.exp %19 : vector<2x128xf32>
    %27 = arith.select %25, %26, %19 : vector<2x128xi1>, vector<2x128xf32>
    %28 = arith.truncf %27 : vector<2x128xf32> to vector<2x128xbf16>
    %c0_12 = arith.constant 0 : index
    %c0_13 = arith.constant 0 : index
    %29 = vector.load %arg6[%c0_12, %c0_13] : memref<2x128xbf16, #tpu.memory_space<vmem>>, vector<2x128xbf16>
    tpu.vector_store %arg6[%c0_12, %c0_13], %28 {strides = array<i32>} : memref<2x128xbf16, #tpu.memory_space<vmem>>, vector<2x128xbf16>,
    return
  }
  func.func @transform_0(%arg0: i32) -> (i32, i32) {
    %c0_i32 = arith.constant 0 : i32
    %c0_i32_0 = arith.constant 0 : i32
    return %arg0, %c0_i32 : i32, i32
  }
  func.func @transform_1(%arg0: i32) -> (i32, i32) {
    %c0_i32 = arith.constant 0 : i32
    %c0_i32_0 = arith.constant 0 : i32
    %c0_i32_1 = arith.constant 0 : i32
    return %c0_i32, %c0_i32_0 : i32, i32
  }
  func.func @transform_2(%arg0: i32) -> (i32, i32) {
    %c0_i32 = arith.constant 0 : i32
    %c0_i32_0 = arith.constant 0 : i32
    %c0_i32_1 = arith.constant 0 : i32
    return %c0_i32, %c0_i32_0 : i32, i32
  }
  func.func @transform_3(%arg0: i32) -> (i32, i32) {
    %c0_i32 = arith.constant 0 : i32
    %c0_i32_0 = arith.constant 0 : i32
    %c0_i32_1 = arith.constant 0 : i32
    return %c0_i32, %c0_i32_0 : i32, i32
  }
  func.func @transform_4(%arg0: i32) -> (i32, i32) {
    %c0_i32 = arith.constant 0 : i32
    %c0_i32_0 = arith.constant 0 : i32
    %c0_i32_1 = arith.constant 0 : i32
    return %c0_i32, %c0_i32_0 : i32, i32
  }
  func.func @transform_5(%arg0: i32) -> (i32, i32) {
    %c0_i32 = arith.constant 0 : i32
    %c0_i32_0 = arith.constant 0 : i32
    return %arg0, %c0_i32 : i32, i32
  }
}

</mosaic_0001>

<bundles_post_ra>
// kernel: encoder_fc.1
= control target key start
LH: loop header
LB: loop body
LE: loop exit
PB: predicated region body
PF: predicated region fallthrough
CT: control target
= control target key end

     0   :  { %10 = vsyncpa [#allocation3], 0  ;;  %s1195_s21 = smov [#allocation2]   ;;  %s1196_s23 = smov 64   ;;  %s1270_s0 = inlined_call_operand.vmem [shape: f32[2,1024], index: 0, kind: input, shape index: {}]   ;;  %s1271_s1 = inlined_call_operand.hbm [shape: bf16[1024,128], index: 1, kind: input, shape index: {}]   ;;  %s1272_s2 = inlined_call_operand.vmem [shape: f32[1,128], index: 2, kind: input, shape index: {}]   ;;  %s1273_s3 = inlined_call_operand.vmem [shape: bf16[128,128], index: 3, kind: input, shape index: {}]   ;;  %s1274_s4 = inlined_call_operand.vmem [shape: f32[1,128], index: 4, kind: input, shape index: {}]   ;;  %s1275_s5 = inlined_call_operand.vmem [shape: bf16[2,128], index: 5, kind: output, shape index: {}]  }
   0x1   :  { %s17_s20 = sshll.u32 %s1271_s1, 4  ;;  %s19_s22 = sshll.u32 %s1195_s21, 4  ;;  %s18_s20 = int_to_ptr.hbm [resolvable:$true] %s17_s20  ;;  %s20_s22 = int_to_ptr.vmem [resolvable:$true] %s19_s22 }
   0x2   :  { %s1197_s24 = smov 4  }
   0x3   :  { %25 = dma.hbm_to_vmem [thread:$0]  %s18_s20, 8192, %s20_s22, [#allocation3], %s1196_s23, %s1196_s23, %s1197_s24  }
   0x4   :  { %1193 = dma.done.wait [#allocation3], 8192  }
   0x5   :  { %1194 = vsyncadd [#allocation3], 4294959104  ;;  %v1093_v0 = vld [vmem:[#allocation2 + $0x38] sm:$0xff]  ;;  %v1092_v4 = vld [vmem:[#allocation2 + $0x30] sm:$0xff] }
   0x6   :  { %v1101_v1 = vld [vmem:[#allocation2 + $0x78] sm:$0xff]  ;;  %583 = vmatpush.bf16.msra.mxu0 %v1093_v0  ;;  %v1100_v5 = vld [vmem:[#allocation2 + $0x70] sm:$0xff]  ;;  %v1091_v8 = vld [vmem:[#allocation2 + $0x28] sm:$0xff] }
   0x7   :  { %v1109_v2 = vld [vmem:[#allocation2 + $0xb8] sm:$0xff]  ;;  %596 = vmatpush.bf16.msra.mxu1 %v1101_v1  ;;  %v1108_v6 = vld [vmem:[#allocation2 + $0xb0] sm:$0xff]  ;;  %v1099_v9 = vld [vmem:[#allocation2 + $0x68] sm:$0xff] }
   0x8   :  { %v1117_v3 = vld [vmem:[#allocation2 + $0xf8] sm:$0xff]  ;;  %609 = vmatpush.bf16.msra.mxu2 %v1109_v2  ;;  %v1116_v7 = vld [vmem:[#allocation2 + $0xf0] sm:$0xff]  ;;  %v1107_v10 = vld [vmem:[#allocation2 + $0xa8] sm:$0xff] }
   0x9   :  { %622 = vmatpush.bf16.msra.mxu3 %v1117_v3  ;;  %v1115_v11 = vld [vmem:[#allocation2 + $0xe8] sm:$0xff]  ;;  %v1090_v12 = vld [vmem:[#allocation2 + $0x20] sm:$0xff]  ;;  %v36_v16 = vld [vmem:[%s1270_s0] sm:$0xff] }
   0xa   :  { %584 = vmatpush.bf16.msra.mxu0 %v1092_v4  ;;  %v1098_v13 = vld [vmem:[#allocation2 + $0x60] sm:$0xff]  ;;  %v1089_v17 = vld [vmem:[#allocation2 + $0x18] sm:$0xff]  ;;  %40 = vst [vmem:[#allocation1] ss:$4 sm:$0xff] %v36_v16  ;;  %v1088_v21 = vld [vmem:[#allocation2 + $0x10] sm:$0xff] }
   0xb   :  { %597 = vmatpush.bf16.msra.mxu1 %v1100_v5  ;;  %v1106_v14 = vld [vmem:[#allocation2 + $0xa0] sm:$0xff]  ;;  %v1097_v18 = vld [vmem:[#allocation2 + $0x58] sm:$0xff]  ;;  %v1096_v22 = vld [vmem:[#allocation2 + $0x50] sm:$0xff] }
   0xc   :  { %610 = vmatpush.bf16.msra.mxu2 %v1108_v6  ;;  %v1114_v15 = vld [vmem:[#allocation2 + $0xe0] sm:$0xff]  ;;  %v1105_v19 = vld [vmem:[#allocation2 + $0x98] sm:$0xff]  ;;  %v1104_v23 = vld [vmem:[#allocation2 + $0x90] sm:$0xff] }
   0xd   :  { %623 = vmatpush.bf16.msra.mxu3 %v1116_v7  ;;  %v1113_v20 = vld [vmem:[#allocation2 + $0xd8] sm:$0xff]  ;;  %v1112_v24 = vld [vmem:[#allocation2 + $0xd0] sm:$0xff]  ;;  %v1087_v25 = vld [vmem:[#allocation2 + $0x8] sm:$0xff] }
   0xe   :  { %585 = vmatpush.bf16.msra.mxu0 %v1091_v8  ;;  %v1095_v26 = vld [vmem:[#allocation2 + $0x48] sm:$0xff]  ;;  %v37_v29 = vld [vmem:[%s1270_s0 + $0x8] sm:$0xff]  ;;  %v1125_v34 = vld [vmem:[#allocation2 + $0x138] sm:$0xff] }
   0xf   :  { %598 = vmatpush.bf16.msra.mxu1 %v1099_v9  ;;  %v1103_v27 = vld [vmem:[#allocation2 + $0x88] sm:$0xff]  ;;  %v1086_v30 = vld [vmem:[#allocation2] sm:$0xff]  ;;  %42 = vst [vmem:[#allocation1 + $0x20] ss:$4 sm:$0xff] %v37_v29  ;;  %v1133_v35 = vld [vmem:[#allocation2 + $0x178] sm:$0xff] }
  0x10   :  { %611 = vmatpush.bf16.msra.mxu2 %v1107_v10  ;;  %v1111_v28 = vld [vmem:[#allocation2 + $0xc8] sm:$0xff]  ;;  %v1094_v31 = vld [vmem:[#allocation2 + $0x40] sm:$0xff]  ;;  %v1141_v40 = vld [vmem:[#allocation2 + $0x1b8] sm:$0xff] }
  0x11   :  { %624 = vmatpush.bf16.msra.mxu3 %v1115_v11  ;;  %v1102_v32 = vld [vmem:[#allocation2 + $0x80] sm:$0xff]  ;;  %v45_v36 = vld.sshfl [vmem:[#allocation1 + $0x10] sm:$0xff pattern:$0x73625140]  ;;  %v1149_v41 = vld [vmem:[#allocation2 + $0x1f8] sm:$0xff] }
  0x12   :  { %586 = vmatpush.bf16.msra.mxu0 %v1090_v12  ;;  %v1110_v33 = vld [vmem:[#allocation2 + $0xc0] sm:$0xff]  ;;  %v43_v37 = vld.sshfl [vmem:[#allocation1] sm:$0xff pattern:$0x73625140]  ;;  %v61_v42 = vpack.c.bf16 %v45_v36, %v45_v36  ;;  %v1124_v46 = vld [vmem:[#allocation2 + $0x130] sm:$0xff] }
  0x13   :  { %599 = vmatpush.bf16.msra.mxu1 %v1098_v13  ;;  %v46_v38 = vld.sshfl [vmem:[#allocation1 + $0x18] sm:$0xff pattern:$0x73625140]  ;;  %v44_v39 = vld.sshfl [vmem:[#allocation1 + $0x8] sm:$0xff pattern:$0x73625140]  ;;  %v59_v43 = vpack.c.bf16 %v43_v37, %v43_v37 }
  0x14   :  { %612 = vmatpush.bf16.msra.mxu2 %v1106_v14  ;;  %v62_v44 = vpack.c.bf16 %v46_v38, %v46_v38  ;;  %v60_v45 = vpack.c.bf16 %v44_v39, %v44_v39  ;;  %v1132_v47 = vld [vmem:[#allocation2 + $0x170] sm:$0xff]  ;;  %v1123_v50 = vld [vmem:[#allocation2 + $0x128] sm:$0xff]  ;;  %v1122_v54 = vld [vmem:[#allocation2 + $0x120] sm:$0xff] }
  0x15   :  { %625 = vmatpush.bf16.msra.mxu3 %v1114_v15  ;;  %v1140_v48 = vld [vmem:[#allocation2 + $0x1b0] sm:$0xff]  ;;  %v1131_v51 = vld [vmem:[#allocation2 + $0x168] sm:$0xff]  ;;  %v1130_v55 = vld [vmem:[#allocation2 + $0x160] sm:$0xff] }
  0x16   :  { %587 = vmatpush.bf16.msra.mxu0 %v1089_v17  ;;  %v1148_v49 = vld [vmem:[#allocation2 + $0x1f0] sm:$0xff]  ;;  %v1139_v52 = vld [vmem:[#allocation2 + $0x1a8] sm:$0xff]  ;;  %v1138_v56 = vld [vmem:[#allocation2 + $0x1a0] sm:$0xff] }
  0x17   :  { %600 = vmatpush.bf16.msra.mxu1 %v1097_v18  ;;  %v1147_v53 = vld [vmem:[#allocation2 + $0x1e8] sm:$0xff]  ;;  %v1146_v57 = vld [vmem:[#allocation2 + $0x1e0] sm:$0xff]  ;;  %v1121_v58 = vld [vmem:[#allocation2 + $0x118] sm:$0xff] }
  0x18   :  { %613 = vmatpush.bf16.msra.mxu2 %v1105_v19  ;;  %v1129_v59 = vld [vmem:[#allocation2 + $0x158] sm:$0xff]  ;;  %v1120_v62 = vld [vmem:[#allocation2 + $0x110] sm:$0xff]  ;;  %v1119_v2 = vld [vmem:[#allocation2 + $0x108] sm:$0xff] }
  0x19   :  { %626 = vmatpush.bf16.msra.mxu3 %v1113_v20  ;;  %v1137_v60 = vld [vmem:[#allocation2 + $0x198] sm:$0xff]  ;;  %v1128_v63 = vld [vmem:[#allocation2 + $0x150] sm:$0xff]  ;;  %v1127_v3 = vld [vmem:[#allocation2 + $0x148] sm:$0xff] }
  0x1a   :  { %588 = vmatpush.bf16.msra.mxu0 %v1088_v21  ;;  %v1145_v61 = vld [vmem:[#allocation2 + $0x1d8] sm:$0xff]  ;;  %v1136_v0 = vld [vmem:[#allocation2 + $0x190] sm:$0xff]  ;;  %v1135_v4 = vld [vmem:[#allocation2 + $0x188] sm:$0xff] }
  0x1b   :  { %601 = vmatpush.bf16.msra.mxu1 %v1096_v22  ;;  %v1144_v1 = vld [vmem:[#allocation2 + $0x1d0] sm:$0xff]  ;;  %v1143_v5 = vld [vmem:[#allocation2 + $0x1c8] sm:$0xff]  ;;  %v1118_v6 = vld [vmem:[#allocation2 + $0x100] sm:$0xff] }
  0x1c   :  { %614 = vmatpush.bf16.msra.mxu2 %v1104_v23  ;;  %v1126_v7 = vld [vmem:[#allocation2 + $0x140] sm:$0xff]  ;;  %v47_v10 = vld.sshfl [vmem:[#allocation1 + $0x20] sm:$0xff pattern:$0x73625140]  ;;  %v1157_v20 = vld [vmem:[%s1273_s3 + $0x38] sm:$0xff] }
  0x1d   :  { %627 = vmatpush.bf16.msra.mxu3 %v1112_v24  ;;  %v1134_v8 = vld [vmem:[#allocation2 + $0x180] sm:$0xff]  ;;  %v49_v12 = vld.sshfl [vmem:[#allocation1 + $0x30] sm:$0xff pattern:$0x73625140]  ;;  %v63_v14 = vpack.c.bf16 %v47_v10, %v47_v10  ;;  %v1154_v29 = vld [vmem:[%s1273_s3 + $0x20] sm:$0xff] }
  0x1e   :  { %589 = vmatpush.bf16.msra.mxu0 %v1087_v25  ;;  %v1142_v9 = vld [vmem:[#allocation2 + $0x1c0] sm:$0xff]  ;;  %v50_v13 = vld.sshfl [vmem:[#allocation1 + $0x38] sm:$0xff pattern:$0x73625140]  ;;  %v65_v16 = vpack.c.bf16 %v49_v12, %v49_v12  ;;  %v1156_v22 = vld [vmem:[%s1273_s3 + $0x30] sm:$0xff] }
  0x1f   :  { %602 = vmatpush.bf16.msra.mxu1 %v1095_v26  ;;  %v48_v11 = vld.sshfl [vmem:[#allocation1 + $0x28] sm:$0xff pattern:$0x73625140]  ;;  %v66_v17 = vpack.c.bf16 %v50_v13, %v50_v13 }
  0x20   :  { %615 = vmatpush.bf16.msra.mxu2 %v1103_v27  ;;  %v64_v15 = vpack.c.bf16 %v48_v11, %v48_v11  ;;  %v1155_v26 = vld [vmem:[%s1273_s3 + $0x28] sm:$0xff]  ;;  %v1161_v27 = vld [vmem:[%s1272_s2] ss:$0 sm:$0xff] }
  0x21   :  { %628 = vmatpush.bf16.msra.mxu3 %v1111_v28  ;;  %v1151_v36 = vld [vmem:[%s1273_s3 + $0x8] sm:$0xff] }
  0x22   :  { %590 = vmatpush.bf16.msra.mxu0 %v1086_v30 }
  0x23   :  { %603 = vmatpush.bf16.msra.mxu1 %v1094_v31 }
  0x24   :  { %616 = vmatpush.bf16.msra.mxu2 %v1102_v32  ;;  %v1153_v32 = vld [vmem:[%s1273_s3 + $0x18] sm:$0xff] }
  0x25   :  { %629 = vmatpush.bf16.msra.mxu3 %v1110_v33  ;;  %591 = vmatmul.bf16.vlgmr.msra.gmra.mxu0 %v59_v43 }
  0x26   :  { %635 = vmatpush.bf16.msrb.mxu0 %v1125_v34  ;;  %604 = vmatmul.bf16.vlgmr.msra.gmra.mxu1 %v60_v45  ;;  %v1152_v34 = vld [vmem:[%s1273_s3 + $0x10] sm:$0xff] }
  0x27   :  { %648 = vmatpush.bf16.msrb.mxu1 %v1133_v35  ;;  %617 = vmatmul.bf16.vlgmr.msra.gmra.mxu2 %v61_v42 }
  0x28   :  { %661 = vmatpush.bf16.msrb.mxu2 %v1141_v40  ;;  %630 = vmatmul.bf16.vlgmr.msra.gmra.mxu3 %v62_v44  ;;  %v1150_v40 = vld [vmem:[%s1273_s3] sm:$0xff] }
  0x29   :  { %674 = vmatpush.bf16.msrb.mxu3 %v1149_v41 }
  0x2a   :  { %636 = vmatpush.bf16.msrb.mxu0 %v1124_v46 }
  0x2b   :  { %649 = vmatpush.bf16.msrb.mxu1 %v1132_v47 }
  0x2c   :  { %662 = vmatpush.bf16.msrb.mxu2 %v1140_v48 }
  0x2d   :  { %675 = vmatpush.bf16.msrb.mxu3 %v1148_v49 }
  0x2e   :  { %637 = vmatpush.bf16.msrb.mxu0 %v1123_v50 }
  0x2f   :  { %650 = vmatpush.bf16.msrb.mxu1 %v1131_v51 }
  0x30   :  { %663 = vmatpush.bf16.msrb.mxu2 %v1139_v52 }
  0x31   :  { %676 = vmatpush.bf16.msrb.mxu3 %v1147_v53 }
  0x32   :  { %638 = vmatpush.bf16.msrb.mxu0 %v1122_v54 }
  0x33   :  { %651 = vmatpush.bf16.msrb.mxu1 %v1130_v55 }
  0x34   :  { %664 = vmatpush.bf16.msrb.mxu2 %v1138_v56 }
  0x35   :  { %677 = vmatpush.bf16.msrb.mxu3 %v1146_v57 }
  0x36   :  { %639 = vmatpush.bf16.msrb.mxu0 %v1121_v58 }
  0x37   :  { %652 = vmatpush.bf16.msrb.mxu1 %v1129_v59 }
  0x38   :  { %665 = vmatpush.bf16.msrb.mxu2 %v1137_v60 }
  0x39   :  { %678 = vmatpush.bf16.msrb.mxu3 %v1145_v61 }
  0x3a   :  { %640 = vmatpush.bf16.msrb.mxu0 %v1120_v62 }
  0x3b   :  { %653 = vmatpush.bf16.msrb.mxu1 %v1128_v63 }
  0x3c   :  { %666 = vmatpush.bf16.msrb.mxu2 %v1136_v0  ;;  %v1162_v0 = vld [vmem:[%s1274_s4] ss:$0 sm:$0xff] }
  0x3d   :  { %679 = vmatpush.bf16.msrb.mxu3 %v1144_v1  ;;  %v783_v1 = vlaneseq }
  0x3e   :  { %641 = vmatpush.bf16.msrb.mxu0 %v1119_v2 }
  0x3f   :  { %654 = vmatpush.bf16.msrb.mxu1 %v1127_v3 }
  0x40   :  { %667 = vmatpush.bf16.msrb.mxu2 %v1135_v4  ;;  %v784_v4 = vand.u32 127, %v783_v1 }
  0x41   :  { %680 = vmatpush.bf16.msrb.mxu3 %v1143_v5 }
  0x42   :  { %642 = vmatpush.bf16.msrb.mxu0 %v1118_v6  ;;  %vm785_vm2 = vcmp.ge.s32.totalorder %v784_v4, 8  ;;  %vm786_vm3 = vcmp.lt.s32.totalorder %v784_v4, 16 }
  0x43   :  { %655 = vmatpush.bf16.msrb.mxu1 %v1126_v7  ;;  %vm787_vm4 = vmand %vm785_vm2, %vm786_vm3 }
  0x44   :  { %668 = vmatpush.bf16.msrb.mxu2 %v1134_v8 }
  0x45   :  { %681 = vmatpush.bf16.msrb.mxu3 %v1142_v9  ;;  %643 = vmatmul.bf16.vlgmr.msrb.gmra.mxu0 %v63_v14 }
  0x46   :  { %656 = vmatmul.bf16.vlgmr.msrb.gmra.mxu1 %v64_v15  ;;  %770 = vmatpush.bf16.msra.mxu0 %v1157_v20 }
  0x47   :  { %669 = vmatmul.bf16.vlgmr.msrb.gmra.mxu2 %v65_v16 }
  0x48   :  { %682 = vmatmul.bf16.vlgmr.msrb.gmra.mxu3 %v66_v17 }
  0x4a   :  { %771 = vmatpush.bf16.msra.mxu0 %v1156_v22 }
  0x4e   :  { %772 = vmatpush.bf16.msra.mxu0 %v1155_v26 }
  0x52   :  { %773 = vmatpush.bf16.msra.mxu0 %v1154_v29 }
  0x56   :  { %774 = vmatpush.bf16.msra.mxu0 %v1153_v32 }
  0x5a   :  { %775 = vmatpush.bf16.msra.mxu0 %v1152_v34 }
  0x5e   :  { %776 = vmatpush.bf16.msra.mxu0 %v1151_v36 }
  0x62   :  { %777 = vmatpush.bf16.msra.mxu0 %v1150_v40 }
  0xa2   :  { %v592_v18 = vpop.f32.mrf.mxu0 }
  0xa3   :  { %v605_v19 = vpop.f32.mrf.mxu1  ;;  %v593_v31 = vadd.f32 %v1161_v27, %v592_v18 }
  0xa5   :  { %v606_v33 = vadd.f32 %v605_v19, %v593_v31 }
  0xaa   :  { %v618_v21 = vpop.f32.mrf.mxu2  ;;  %v594_v24 = vpop.f32.mrf.mxu0 }
  0xab   :  { %v631_v23 = vpop.f32.mrf.mxu3  ;;  %v607_v25 = vpop.f32.mrf.mxu1  ;;  %v619_v35 = vadd.f32 %v618_v21, %v606_v33 }
  0xad   :  { %v632_v37 = vadd.f32 %v631_v23, %v619_v35 }
  0xb2   :  { %v620_v28 = vpop.f32.mrf.mxu2 }
  0xb3   :  { %v633_v30 = vpop.f32.mrf.mxu3 }
  0xc2   :  { %v644_v38 = vpop.f32.mrf.mxu0 }
  0xc3   :  { %v657_v39 = vpop.f32.mrf.mxu1  ;;  %v645_v41 = vadd.f32 %v644_v38, %v632_v37 }
  0xc5   :  { %v658_v42 = vadd.f32 %v657_v39, %v645_v41 }
  0xca   :  { %v670_v43 = vpop.f32.mrf.mxu2  ;;  %v646_v46 = vpop.f32.mrf.mxu0 }
  0xcb   :  { %v683_v44 = vpop.f32.mrf.mxu3  ;;  %v671_v45 = vadd.f32 %v670_v43, %v658_v42  ;;  %v659_v47 = vpop.f32.mrf.mxu1 }
  0xcd   :  { %v684_v48 = vadd.f32 %v683_v44, %v671_v45 }
  0xcf   :  { %v687_v49 = vmin.f32 %v684_v48, 20.0  ;;  %vm690_vm1 = vcmp.gt.f32.partialorder %v684_v48, 20.0 }
  0xd1   :  { %v688_v50 = vmul.f32 1.442695, %v687_v49 }
  0xd2   :  { %v672_v51 = vpop.f32.mrf.mxu2 }
  0xd3   :  { %v685_v52 = vpop.f32.mrf.mxu3  ;;  %1163 = vpow2.f32 %v688_v50 }
  0xd9   :  { %v1164_v53 = vpop.eup %1163 }
  0xda   :  { %v691_v54 = vadd.f32 1.0, %v1164_v53  ;;  %v694_v55 = vmul.f32 -0.5, %v1164_v53  ;;  %v697_v57 = vand.u32 2147483647, %v1164_v53 }
  0xdc   :  { %1165 = vlog2.f32 %v691_v54  ;;  %v695_v56 = vadd.f32 1.0, %v694_v55  ;;  %vm698_vm0 = vcmp.lt.f32.partialorder %v697_v57, 0.0004427343 }
  0xde   :  { %v696_v60 = vmul.f32 %v1164_v53, %v695_v56 }
  0xe2   :  { %v1166_v58 = vpop.eup %1165 }
  0xe3   :  { %v693_v59 = vmul.f32 0.6931472, %v1166_v58 }
  0xe5   :  { %v699_v61 = vsel %vm698_vm0, %v696_v60, %v693_v59 }
  0xe6   :  { %v700_v62 = vsel %vm690_vm1, %v684_v48, %v699_v61 }
  0xe7   :  { %v701_v63 = vpack.c.bf16 %v700_v62, %v700_v62 }
  0xe9   :  { %778 = vmatmul.bf16.vlgmr.msra.gmra.mxu0 %v701_v63 }
 0x166   :  { %v779_v2 = vpop.f32.mrf.mxu0 }
 0x167   :  { %v780_v3 = vadd.f32 %v1162_v0, %v779_v2 }
 0x169   :  { %v788_v5 = vmul.f32 1.442695, %v780_v3 }
 0x16b   :  { %1167 = vpow2.f32 %v788_v5 }
 0x16e   :  { %v781_v6 = vpop.f32.mrf.mxu0 }
 0x171   :  { %v1168_v7 = vpop.eup %1167 }
 0x172   :  { %v790_v8 = vsel %vm787_vm4, %v1168_v7, %v780_v3 }
 0x173   :  { %v791_v9 = vpack.c.bf16 %v790_v8, %v790_v8 }
 0x175   :  { %792 = vst [vmem:[%s1275_s5] sm:$0x1] %v791_v9 }
 0x176   :  { %797 = vsyncpa [#allocation3], 1 }

</bundles_post_ra>
